<compile_context>
chip_gen: v6e
topology: v6e:2x2x1
jax: 0.10.0
libtpu: 0.0.40
codegen_flags: <defaults>
</compile_context>

<pallas_src>
import functools

import jax
import jax.numpy as jnp
from jax import lax
from jax.experimental import pallas as pl
from jax.experimental.pallas import tpu as pltpu


def _round_up(x, m):
    return ((x + m - 1) // m) * m


def _mtkgnn_rel_kernel(base_ref, e2_ref, w1bT_ref, w2T_ref, b2_ref, out_ref,
                       *, tanh_dtype):
    """Scores every batch row against one lane-tile of TN entities.

    base_ref : (B, Hp, 1)  per-row (e1@W1a + rel@W1c)^T columns   (resident)
    e2_ref   : (TN, D)     entity-embedding tile, natural layout  (streamed)
    w1bT_ref : (Hp, D)     e2-part of Linear(3D->H, bias=False), transposed+padded
    w2T_ref  : (1, Hp)     Linear(H->1) weight, transposed+padded
    b2_ref   : (1, 1)      Linear(H->1) bias (SMEM scalar)
    out_ref  : (B, TN)     sigmoid scores, lane-dense (entities on lanes)
    """
    # Shared across the whole batch: z^T = W1b^T @ E2_tile^T -> (Hp, TN).
    # trans_b contraction keeps emb_e in its natural (N, D) layout (no wrapper
    # transpose); MXU/XLU have plenty of slack in this EUP-bound kernel.
    zT = lax.dot_general(
        w1bT_ref[...], e2_ref[...],
        dimension_numbers=(((1,), (1,)), ((), ())),
        preferred_element_type=jnp.float32)                        # (Hp, TN)
    w2T = w2T_ref[...]
    num_b = out_ref.shape[0]

    def body(b, carry):
        base_col = base_ref[b]                                     # (Hp, 1) f32
        # Dropout(0.5) == identity at inference.
        hT = jnp.tanh((zT + base_col).astype(tanh_dtype))          # (Hp, TN)
        logits = jnp.dot(w2T.astype(hT.dtype), hT,
                         preferred_element_type=jnp.float32)       # (1, TN)
        out_ref[pl.ds(b, 1), :] = logits                           # raw logits
        return carry

    lax.fori_loop(0, num_b, body, 0)
    # One batched bias-add + sigmoid pass over the whole (B, TN) tile.
    out_ref[...] = jax.nn.sigmoid(out_ref[...] + b2_ref[0, 0])


def mtkgnn_forward(e1, rel, params, *, tile_n=None, compute_dtype=None,
                   tanh_dtype=jnp.float32):
    """Pallas equivalent of MTKGNN.forward(e1, rel) -> (B, num_entities).

    compute_dtype : dtype of the streamed entity table / W1b matmul operands.
                    Default None = emb_e.dtype (no per-call full-table cast).
    tanh_dtype    : dtype of the tanh activation. bf16 roughly halves the
                    binding EUP/VPU work on v6e/v7x; keep f32 on v5e.
    Note: for B == 1 torch's pred.squeeze() would give shape (N,); this wrapper
    always returns (B, N).
    """
    emb_e = params["emb_e"]       # (N, D)
    emb_rel = params["emb_rel"]   # (2R, D)
    w1 = params["rel_w1"]         # (3D, H) == torch Linear(3D,100).weight.T
    w2 = params["rel_w2"]         # (H, 1)  == torch Linear(100,1).weight.T
    b2 = params["rel_b2"]         # (1, 1)

    N, D = emb_e.shape
    H = w1.shape[1]
    B = int(e1.shape[0])

    compute_dtype = jnp.dtype(emb_e.dtype if compute_dtype is None else compute_dtype)
    tanh_dtype = jnp.dtype(tanh_dtype)
    any_bf16 = (compute_dtype == jnp.dtype(jnp.bfloat16)
                or tanh_dtype == jnp.dtype(jnp.bfloat16))
    # Hidden dim only lives on sublanes / the contraction dim -> pad to the
    # minimal sublane multiple (8 for f32, 16 if any bf16 tile uses it).
    Hp = _round_up(H, 16 if any_bf16 else 8)

    if tile_n is None:
        # Big tiles amortize the ~0.35us/step grid overhead, but keep >=2 grid
        # steps so the single "parallel" axis can shard across v7x's 2 TCs.
        tile_n = min(2048, max(512, _round_up(pl.cdiv(N, 2), 128)))
        tile_n = min(tile_n, _round_up(N, 128))
    n_tiles = pl.cdiv(N, tile_n)

    # --- glue (torch.index_select) + tiny precompute, all outside the kernel ---
    e1_emb = jnp.take(emb_e, e1, axis=0)          # (B, D)
    rel_emb = jnp.take(emb_rel, rel, axis=0)      # (B, D)
    w1a, w1b, w1c = w1[:D], w1[D:2 * D], w1[2 * D:]

    # base = e1@W1a + rel@W1c: shared over all entities, computed once per row.
    base = (e1_emb @ w1a + rel_emb @ w1c).astype(jnp.float32)          # (B, H)
    # Stored as (B, Hp, 1) so the kernel can index row b dynamically along the
    # leading axis and get a ready-to-broadcast (Hp, 1) column.
    base3 = jnp.zeros((B, Hp, 1), jnp.float32).at[:, :H, 0].set(base)

    # Weights: transpose + zero-pad H -> Hp (padded rows/cols contribute 0).
    if emb_e.dtype != compute_dtype:
        # TODO(synk): store emb_e pre-cast in production; this is a full-table pass.
        emb_e_c = emb_e.astype(compute_dtype)
    else:
        emb_e_c = emb_e
    w1bT = jnp.zeros((Hp, D), compute_dtype).at[:H, :].set(
        w1b.T.astype(compute_dtype))                                   # (Hp, D)
    w2T = jnp.zeros((1, Hp), jnp.float32).at[:, :H].set(
        w2.T.astype(jnp.float32))                                      # (1, Hp)

    # VMEM budget (double-buffered entity tile + zT + one live hT + out blocks
    # + resident small operands), with 2x headroom, clamped to sane limits.
    e2_bytes = compute_dtype.itemsize
    tanh_bytes = tanh_dtype.itemsize
    need = (2 * tile_n * D * e2_bytes          # double-buffered entity tile
            + tile_n * Hp * 4                  # zT (f32)
            + tile_n * Hp * tanh_bytes         # one live hT (fori_loop-bounded)
            + 2 * B * tile_n * 4               # double-buffered output block
            + 2 * (B * Hp + Hp * D + Hp) * 4)  # resident small operands
    vmem_limit = int(min(64 * 2**20, max(2 * need, 16 * 2**20)))

    cost = pl.CostEstimate(
        flops=int(2 * Hp * D * N + 2 * B * Hp * N),
        transcendentals=int(B * Hp * N + B * N),
        bytes_accessed=int(N * D * e2_bytes + B * N * 4
                           + Hp * D * e2_bytes + B * Hp * 4))

    out = pl.pallas_call(
        functools.partial(_mtkgnn_rel_kernel, tanh_dtype=tanh_dtype),
        out_shape=jax.ShapeDtypeStruct((B, N), jnp.float32),
        grid_spec=pltpu.PrefetchScalarGridSpec(
            num_scalar_prefetch=0,
            grid=(n_tiles,),
            in_specs=[
                pl.BlockSpec((B, Hp, 1), lambda j: (0, 0, 0)),      # base (resident)
                pl.BlockSpec((tile_n, D), lambda j: (j, 0)),        # entity tile (streamed)
                pl.BlockSpec((Hp, D), lambda j: (0, 0)),            # w1bT (resident)
                pl.BlockSpec((1, Hp), lambda j: (0, 0)),            # w2T  (resident)
                pl.BlockSpec(memory_space=pltpu.MemorySpace.SMEM),  # b2 scalar
            ],
            out_specs=pl.BlockSpec((B, tile_n), lambda j: (0, j)),
        ),
        compiler_params=pltpu.CompilerParams(
            dimension_semantics=("parallel",),   # entity tiles shard across TCs
            vmem_limit_bytes=vmem_limit),
        cost_estimate=cost,
    )(base3, emb_e_c, w1bT, w2T, b2)

    return out                                   # (B, N)


def init_params(key, num_entities, num_relations, emb_dim, hidden=100):
    """Deterministic xavier-normal init matching the torch module's shapes."""
    ks = jax.random.split(key, 4)

    def xavier(k, shape):  # torch xavier_normal_: std = sqrt(2/(fan_in+fan_out))
        fan_out, fan_in = shape[0], shape[1]
        std = (2.0 / (fan_in + fan_out)) ** 0.5
        return std * jax.random.normal(k, shape, jnp.float32)

    emb_e = xavier(ks[0], (num_entities, emb_dim))
    emb_rel = xavier(ks[1], (2 * num_relations, emb_dim))
    # rel_net = Linear(3D,100,bias=False) -> Tanh -> Dropout -> Linear(100,1) -> Sigmoid
    w1 = xavier(ks[2], (hidden, 3 * emb_dim)).T   # stored (3D, H)
    w2 = xavier(ks[3], (1, hidden)).T             # stored (H, 1)
    b2 = jnp.zeros((1, 1), jnp.float32)
    return {"emb_e": emb_e, "emb_rel": emb_rel,
            "rel_w1": w1, "rel_w2": w2, "rel_b2": b2}


if __name__ == "__main__":
    # Small but non-trivial: 1000 entities -> 2 entity tiles (one ragged),
    # exercising both the streaming loop and the partial-tile path.
    num_entities, num_relations, emb_dim, batch = 1000, 8, 32, 4

    key = jax.random.PRNGKey(0)
    pkey, ekey, rkey = jax.random.split(key, 3)
    params = init_params(pkey, num_entities, num_relations, emb_dim)
    e1 = jax.random.randint(ekey, (batch,), 0, num_entities, dtype=jnp.int32)
    rel = jax.random.randint(rkey, (batch,), 0, 2 * num_relations, dtype=jnp.int32)

    pred = mtkgnn_forward(e1, rel, params)
    pred = jax.block_until_ready(pred)
    assert pred.shape == (batch, num_entities)

    # Pure-JAX reference of the torch forward (eval mode).
    e1_emb = jnp.take(params["emb_e"], e1, axis=0)
    rel_emb = jnp.take(params["emb_rel"], rel, axis=0)
    inputs = jnp.concatenate([
        jnp.broadcast_to(e1_emb[:, None, :], (batch, num_entities, emb_dim)),
        jnp.broadcast_to(params["emb_e"][None, :, :], (batch, num_entities, emb_dim)),
        jnp.broadcast_to(rel_emb[:, None, :], (batch, num_entities, emb_dim)),
    ], axis=2)
    h_ref = jnp.tanh(jnp.einsum("bnk,kh->bnh", inputs, params["rel_w1"],
                                preferred_element_type=jnp.float32))
    ref = jax.nn.sigmoid(
        jnp.einsum("bnh,ho->bno", h_ref, params["rel_w2"],
                   preferred_element_type=jnp.float32)[..., 0]
        + params["rel_b2"][0, 0])

    max_err = float(jnp.max(jnp.abs(pred - ref)))
    assert jnp.allclose(pred, ref, atol=1e-3, rtol=1e-3), max_err
    print("KERNEL_OK")
</pallas_src>

<mosaic_0001>
module attributes {stable_mosaic.version = 11 : i64} {
  func.func @_mtkgnn_rel_kernel(%arg0: i32, %arg1: memref<4x104x1xf32, #tpu.memory_space<vmem>>, %arg2: memref<512x32xf32, #tpu.memory_space<vmem>>, %arg3: memref<104x32xf32, #tpu.memory_space<vmem>>, %arg4: memref<1x104xf32, #tpu.memory_space<vmem>>, %arg5: memref<1x1xf32, #tpu.memory_space<smem>>, %arg6: memref<4x512xf32, #tpu.memory_space<vmem>>) attributes {dimension_semantics = [#tpu.dimension_semantics<parallel>], iteration_bounds = array<i64: 2>, scalar_prefetch = 0 : i64, scratch_operands = 0 : i64, tpu.core_type = #tpu.core_type<tc>, window_params = [{pipeline_mode = #tpu.pipeline_mode<synchronous>, transform_indices = @transform_0, window_bounds = array<i64: 4, 104, 1>}, {transform_indices = @transform_1, window_bounds = array<i64: 512, 32>}, {pipeline_mode = #tpu.pipeline_mode<synchronous>, transform_indices = @transform_2, window_bounds = array<i64: 104, 32>}, {pipeline_mode = #tpu.pipeline_mode<synchronous>, transform_indices = @transform_3, window_bounds = array<i64: 1, 104>}, {transform_indices = @transform_4, window_bounds = array<i64: 1, 1>}, {transform_indices = @transform_5, window_bounds = array<i64: 4, 512>}]} {
    %c0 = arith.constant 0 : index
    %c0_0 = arith.constant 0 : index
    %0 = vector.load %arg3[%c0, %c0_0] : memref<104x32xf32, #tpu.memory_space<vmem>>, vector<104x32xf32>
    %c0_1 = arith.constant 0 : index
    %c0_2 = arith.constant 0 : index
    %1 = vector.load %arg2[%c0_1, %c0_2] : memref<512x32xf32, #tpu.memory_space<vmem>>, vector<512x32xf32>
    %cst = arith.constant dense<0.000000e+00> : vector<104x512xf32>
    %2 = tpu.matmul %0, %1, %cst {dimension_numbers = #tpu.dot_dimension_numbers<[1], [1], [0], [0], [0, 0, 1, 0], [], []>} : vector<104x32xf32>, vector<512x32xf32>, vector<104x512xf32> -> vector<104x512xf32>
    %c0_3 = arith.constant 0 : index
    %c0_4 = arith.constant 0 : index
    %3 = vector.load %arg4[%c0_3, %c0_4] : memref<1x104xf32, #tpu.memory_space<vmem>>, vector<1x104xf32>
    %c0_i32 = arith.constant 0 : i32
    %c4_i32 = arith.constant 4 : i32
    %4 = arith.addi %c0_i32, %c4_i32 : i32
    %c1_i32 = arith.constant 1 : i32
    scf.for %arg7 = %c0_i32 to %4 step %c1_i32  : i32 {
      %15 = arith.index_cast %arg7 : i32 to index
      %c0_13 = arith.constant 0 : index
      %c0_14 = arith.constant 0 : index
      %16 = vector.load %arg1[%15, %c0_13, %c0_14] : memref<4x104x1xf32, #tpu.memory_space<vmem>>, vector<1x104x1xf32>
      %17 = vector.shape_cast %16 : vector<1x104x1xf32> to vector<104x1xf32>
      %18 = vector.broadcast %17 : vector<104x1xf32> to vector<104x512xf32>
      %19 = arith.addf %2, %18 : vector<104x512xf32>
      %20 = math.tanh %19 : vector<104x512xf32>
      %cst_15 = arith.constant dense<0.000000e+00> : vector<1x512xf32>
      %21 = tpu.matmul %3, %20, %cst_15 {dimension_numbers = #tpu.dot_dimension_numbers<[1], [0], [0], [1], [0, 0, 1, 1], [], []>} : vector<1x104xf32>, vector<104x512xf32>, vector<1x512xf32> -> vector<1x512xf32>
      %22 = arith.index_cast %arg7 : i32 to index
      %c0_16 = arith.constant 0 : index
      %23 = vector.load %arg6[%22, %c0_16] : memref<4x512xf32, #tpu.memory_space<vmem>>, vector<1x512xf32>
      tpu.vector_store %arg6[%22, %c0_16], %21 {strides = array<i32>} : memref<4x512xf32, #tpu.memory_space<vmem>>, vector<1x512xf32>,
    }
    %c4_i32_5 = arith.constant 4 : i32
    %c0_6 = arith.constant 0 : index
    %c0_7 = arith.constant 0 : index
    %5 = vector.load %arg6[%c0_6, %c0_7] : memref<4x512xf32, #tpu.memory_space<vmem>>, vector<4x512xf32>
    %c0_8 = arith.constant 0 : index
    %c0_9 = arith.constant 0 : index
    %6 = memref.load %arg5[%c0_8, %c0_9] : memref<1x1xf32, #tpu.memory_space<smem>>
    %7 = vector.broadcast %6 : f32 to vector<4x512xf32>
    %8 = arith.addf %5, %7 : vector<4x512xf32>
    %9 = arith.negf %8 : vector<4x512xf32>
    %10 = math.exp %9 : vector<4x512xf32>
    %cst_10 = arith.constant 1.000000e+00 : f32
    %11 = vector.broadcast %cst_10 : f32 to vector<4x512xf32>
    %12 = arith.addf %11, %10 : vector<4x512xf32>
    %13 = arith.divf %11, %12 : vector<4x512xf32>
    %c0_11 = arith.constant 0 : index
    %c0_12 = arith.constant 0 : index
    %14 = vector.load %arg6[%c0_11, %c0_12] : memref<4x512xf32, #tpu.memory_space<vmem>>, vector<4x512xf32>
    tpu.vector_store %arg6[%c0_11, %c0_12], %13 {strides = array<i32>} : memref<4x512xf32, #tpu.memory_space<vmem>>, vector<4x512xf32>,
    return
  }
  func.func @transform_0(%arg0: i32) -> (i32, i32, i32) {
    %c0_i32 = arith.constant 0 : i32
    %c0_i32_0 = arith.constant 0 : i32
    %c0_i32_1 = arith.constant 0 : i32
    %c0_i32_2 = arith.constant 0 : i32
    return %c0_i32, %c0_i32_0, %c0_i32_1 : i32, i32, i32
  }
  func.func @transform_1(%arg0: i32) -> (i32, i32) {
    %c0_i32 = arith.constant 0 : i32
    %c0_i32_0 = arith.constant 0 : i32
    return %arg0, %c0_i32 : i32, i32
  }
  func.func @transform_2(%arg0: i32) -> (i32, i32) {
    %c0_i32 = arith.constant 0 : i32
    %c0_i32_0 = arith.constant 0 : i32
    %c0_i32_1 = arith.constant 0 : i32
    return %c0_i32, %c0_i32_0 : i32, i32
  }
  func.func @transform_3(%arg0: i32) -> (i32, i32) {
    %c0_i32 = arith.constant 0 : i32
    %c0_i32_0 = arith.constant 0 : i32
    %c0_i32_1 = arith.constant 0 : i32
    return %c0_i32, %c0_i32_0 : i32, i32
  }
  func.func @transform_4(%arg0: i32) -> (i32, i32) {
    %c0_i32 = arith.constant 0 : i32
    %c0_i32_0 = arith.constant 0 : i32
    %c0_i32_1 = arith.constant 0 : i32
    return %c0_i32, %c0_i32_0 : i32, i32
  }
  func.func @transform_5(%arg0: i32) -> (i32, i32) {
    %c0_i32 = arith.constant 0 : i32
    %c0_i32_0 = arith.constant 0 : i32
    return %c0_i32, %arg0 : i32, i32
  }
}

</mosaic_0001>

<bundles_post_ra>
// kernel: tpu_custom_call.1
= control target key start
LH: loop header
LB: loop body
LE: loop exit
PB: predicated region body
PF: predicated region fallthrough
CT: control target
= control target key end

     0   :  { %s2602_s0 = inlined_call_operand.vmem [shape: f32[4,104,1], index: 0, kind: input, shape index: {}]   ;;  %s2603_s1 = inlined_call_operand.vmem [shape: f32[1000,32], index: 1, kind: input, shape index: {}]   ;;  %s2604_s2 = inlined_call_operand.vmem [shape: f32[104,32], index: 2, kind: input, shape index: {}]   ;;  %s2605_s3 = inlined_call_operand.vmem [shape: f32[1,104], index: 3, kind: input, shape index: {}]   ;;  %s2606_s4 = inlined_call_operand.<no memory space> [shape: f32[1,1], index: 4, kind: input, shape index: {}]   ;;  %s2607_s5 = inlined_call_operand.hbm [shape: f32[4,1000], index: 5, kind: output, shape index: {}]  }
   0x1   :  { %10 = sst [smem:[#allocation2]] %s2606_s4 }
   0x2   :  { %11 = vsyncpa [#allocation4], 0 }
   0x3   :  { %13 = vsyncpa [#allocation4 + $0x1], 0  ;;  %s1770_s20 = smov 0   ;;  %s1772_s21 = smov 0  }
   0x4   :  { %s1774_s22 = smov 0   ;;  %s1776_s23 = smov 0  }
   0x5 LB: > { %s1791_s4 = sadd.s32 4294967295, %s1727_s23   ;;  %s1273_s24 = sadd.s32 4294967294, %s1727_s23   ;;  %s1727_s23 = sphi %s1776_s23, %s2789_s23   ;;  %s1723_s22 = sphi %s1774_s22, %s2788_s22   ;;  %s1719_s21 = sphi %s1772_s21, %s2787_s21   ;;  %s1715_s20 = sphi %s1770_s20, %s2786_s20  }
   0x6   : > { %s1795_s25 = sadd.s32 1, %s1727_s23   ;;  %s136_s26 = sadd.s32 1, %s1723_s22 }
   0x7   : > { %s133_s27 = ssub.s32 %s1727_s23, %s1795_s25  ;;  %p146_p0 = scmp.ne.s32.totalorder %s1723_s22, %s1719_s21 }
   0x8   : > { %p134_p1 = scmp.eq.s32.totalorder %s133_s27, 0  ;;  %p147_p2 = scmp.eq.s32.totalorder %s1791_s4, 1 }
   0x9   : > { %p152_p3 = scmp.ne.s32.totalorder %s1719_s21, %s1715_s20  ;;  %p153_p4 = scmp.eq.s32.totalorder %s1273_s24, 1 }
   0xa   : > { %s1806_s28 = scalar_select %p134_p1, %s1723_s22, %s136_s26  }
   0xb   : > { %p1808_p5 = por %p147_p2, %p146_p0  ;;  %p1812_p6 = por %p153_p4, %p152_p3 }
   0xc   : > { %p1276_p7 = scmp.ge.s32.totalorder %s1727_s23, 1  ;;  %p200_p8 = scmp.lt.s32.totalorder %s1727_s23, 3 }
   0xe   : > { %p201_p9 = pnand %p1276_p7, %p200_p8 }
  0x10   : > { %204 = sbr.rel (%p201_p9) target bundleno = 675 (0x2a3), region = 40 }
  0x15   : > { %s229_s6 = sand.u32 1, %s1719_s21   ;;  %s1278_s7 = sshll.u32 %s1791_s4, 6  ;;  %v1823_v0 = vld [vmem:[%s2604_s2] sm:$0xff]  ;;  %v1828_v1 = vld [vmem:[%s2604_s2 + $0x8] sm:$0xff]  ;;  %v1833_v2 = vld [vmem:[%s2604_s2 + $0x10] sm:$0xff] }
  0x16   : > { %2636 = vst [vmem:[#allocation6_spill] sm:$0xff] %v1823_v0  ;;  %2637 = vst [vmem:[#allocation7_spill] sm:$0xff] %v1828_v1  ;;  %s1837_s14 = sshll.u32 %s229_s6, 4  ;;  %p237_p10 = scmp.lt.s32.totalorder %s1278_s7, 124  ;;  %v1842_v3 = vld [vmem:[%s2604_s2 + $0x18] sm:$0xff]  ;;  %v1847_v4 = vld [vmem:[%s2604_s2 + $0x20] sm:$0xff] }
  0x17   : > { %2638 = vst [vmem:[#allocation8_spill] sm:$0xff] %v1833_v2  ;;  %2639 = vst [vmem:[#allocation9_spill] sm:$0xff] %v1842_v3  ;;  %v1852_v5 = vld [vmem:[%s2604_s2 + $0x28] sm:$0xff]  ;;  %v1857_v6 = vld [vmem:[%s2604_s2 + $0x30] sm:$0xff]  ;;  %s2094_s12 = smov 0  }
  0x18   : > { %2640 = vst [vmem:[#allocation10_spill] sm:$0xff] %v1847_v4  ;;  %2641 = vst [vmem:[#allocation11_spill] sm:$0xff] %v1852_v5  ;;  %v1862_v7 = vld [vmem:[%s2604_s2 + $0x38] sm:$0xff]  ;;  %v1867_v8 = vld [vmem:[%s2604_s2 + $0x40] sm:$0xff]  ;;  %s2791_s7 = smov (!%p237_p10, %s1278_s7), 124 }
  0x19   : > { %2642 = vst [vmem:[#allocation12_spill] sm:$0xff] %v1857_v6  ;;  %2643 = vst [vmem:[#allocation13_spill] sm:$0xff] %v1862_v7  ;;  %v1872_v9 = vld [vmem:[%s2604_s2 + $0x48] sm:$0xff]  ;;  %v1877_v10 = vld [vmem:[%s2604_s2 + $0x50] sm:$0xff]  ;;  %s1279_s8 = sshll.u32 %s2791_s7, 3  ;;  %s2092_s7 = scalar_lea.vmem [#allocation3], %s1837_s14 }
  0x1a   : > { %2644 = vst [vmem:[#allocation14_spill] sm:$0xff] %v1867_v8  ;;  %2645 = vst [vmem:[#allocation15_spill] sm:$0xff] %v1872_v9  ;;  %v1882_v11 = vld [vmem:[%s2604_s2 + $0x58] sm:$0xff]  ;;  %v1887_v12 = vld [vmem:[%s2604_s2 + $0x60] sm:$0xff]  ;;  %s1897_s11 = scalar_lea.vmem %s2603_s1, %s1279_s8 }
  0x1b   : > { %2646 = vst [vmem:[#allocation16_spill] sm:$0xff] %v1877_v10  ;;  %2647 = vst [vmem:[#allocation17_spill] sm:$0xff] %v1882_v11  ;;  %v1892_v13 = vld [vmem:[%s2605_s3] sm:$0x1]  ;;  %v1903_v15 = vld [vmem:[%s1897_s11 + $0x8] sm:$0xff] }
  0x1c   : > { %2648 = vst [vmem:[#allocation18_spill] sm:$0xff] %v1887_v12  ;;  %2649 = vst [vmem:[#allocation19_spill] sm:$0xff] %v1892_v13  ;;  %v1900_v14 = vld [vmem:[%s1897_s11] sm:$0xff]  ;;  %v1906_v16 = vld [vmem:[%s1897_s11 + $0x10] sm:$0xff] }
  0x1d   : > { %2650 = vst [vmem:[#allocation20_spill] sm:$0xff] %v1900_v14  ;;  %2651 = vst [vmem:[#allocation21_spill] sm:$0xff] %v1903_v15  ;;  %v1909_v17 = vld [vmem:[%s1897_s11 + $0x18] sm:$0xff]  ;;  %v1912_v18 = vld [vmem:[%s1897_s11 + $0x20] sm:$0xff] }
  0x1e   : > { %2652 = vst [vmem:[#allocation22_spill] sm:$0xff] %v1906_v16  ;;  %2653 = vst [vmem:[#allocation23_spill] sm:$0xff] %v1909_v17  ;;  %v1915_v19 = vld [vmem:[%s1897_s11 + $0x28] sm:$0xff]  ;;  %v1918_v20 = vld [vmem:[%s1897_s11 + $0x30] sm:$0xff] }
  0x1f   : > { %2654 = vst [vmem:[#allocation24_spill] sm:$0xff] %v1912_v18  ;;  %2655 = vst [vmem:[#allocation25_spill] sm:$0xff] %v1915_v19  ;;  %v1921_v21 = vld [vmem:[%s1897_s11 + $0x38] sm:$0xff]  ;;  %v1924_v22 = vld [vmem:[%s1897_s11 + $0x40] sm:$0xff] }
  0x20   : > { %2656 = vst [vmem:[#allocation26_spill] sm:$0xff] %v1918_v20  ;;  %2657 = vst [vmem:[#allocation27_spill] sm:$0xff] %v1921_v21  ;;  %v1927_v23 = vld [vmem:[%s1897_s11 + $0x48] sm:$0xff]  ;;  %v1930_v24 = vld [vmem:[%s1897_s11 + $0x50] sm:$0xff] }
  0x21   : > { %2658 = vst [vmem:[#allocation28_spill] sm:$0xff] %v1924_v22  ;;  %2659 = vst [vmem:[#allocation29_spill] sm:$0xff] %v1927_v23  ;;  %v1933_v25 = vld [vmem:[%s1897_s11 + $0x58] sm:$0xff]  ;;  %v1936_v26 = vld [vmem:[%s1897_s11 + $0x60] sm:$0xff] }
  0x22   : > { %2660 = vst [vmem:[#allocation30_spill] sm:$0xff] %v1930_v24  ;;  %2661 = vst [vmem:[#allocation31_spill] sm:$0xff] %v1933_v25  ;;  %v1939_v27 = vld [vmem:[%s1897_s11 + $0x68] sm:$0xff]  ;;  %v1942_v28 = vld [vmem:[%s1897_s11 + $0x70] sm:$0xff] }
  0x23   : > { %2662 = vst [vmem:[#allocation32_spill] sm:$0xff] %v1936_v26  ;;  %2663 = vst [vmem:[#allocation33_spill] sm:$0xff] %v1939_v27  ;;  %v1945_v29 = vld [vmem:[%s1897_s11 + $0x78] sm:$0xff]  ;;  %v1948_v30 = vld [vmem:[%s1897_s11 + $0x80] sm:$0xff] }
  0x24   : > { %2664 = vst [vmem:[#allocation34_spill] sm:$0xff] %v1942_v28  ;;  %2665 = vst [vmem:[#allocation35_spill] sm:$0xff] %v1945_v29  ;;  %v1951_v31 = vld [vmem:[%s1897_s11 + $0x88] sm:$0xff]  ;;  %v1954_v32 = vld [vmem:[%s1897_s11 + $0x90] sm:$0xff] }
  0x25   : > { %2666 = vst [vmem:[#allocation36_spill] sm:$0xff] %v1948_v30  ;;  %2667 = vst [vmem:[#allocation37_spill] sm:$0xff] %v1951_v31  ;;  %v1957_v33 = vld [vmem:[%s1897_s11 + $0x98] sm:$0xff]  ;;  %v1960_v34 = vld [vmem:[%s1897_s11 + $0xa0] sm:$0xff] }
  0x26   : > { %2668 = vst [vmem:[#allocation38_spill] sm:$0xff] %v1954_v32  ;;  %2669 = vst [vmem:[#allocation39_spill] sm:$0xff] %v1957_v33  ;;  %v1963_v35 = vld [vmem:[%s1897_s11 + $0xa8] sm:$0xff]  ;;  %v1966_v36 = vld [vmem:[%s1897_s11 + $0xb0] sm:$0xff] }
  0x27   : > { %2670 = vst [vmem:[#allocation40_spill] sm:$0xff] %v1960_v34  ;;  %2671 = vst [vmem:[#allocation41_spill] sm:$0xff] %v1963_v35  ;;  %v1969_v37 = vld [vmem:[%s1897_s11 + $0xb8] sm:$0xff]  ;;  %v1972_v38 = vld [vmem:[%s1897_s11 + $0xc0] sm:$0xff] }
  0x28   : > { %2672 = vst [vmem:[#allocation42_spill] sm:$0xff] %v1966_v36  ;;  %2673 = vst [vmem:[#allocation43_spill] sm:$0xff] %v1969_v37  ;;  %v1975_v39 = vld [vmem:[%s1897_s11 + $0xc8] sm:$0xff]  ;;  %v1978_v40 = vld [vmem:[%s1897_s11 + $0xd0] sm:$0xff] }
  0x29   : > { %2674 = vst [vmem:[#allocation44_spill] sm:$0xff] %v1972_v38  ;;  %2675 = vst [vmem:[#allocation45_spill] sm:$0xff] %v1975_v39  ;;  %v1981_v41 = vld [vmem:[%s1897_s11 + $0xd8] sm:$0xff]  ;;  %v1984_v42 = vld [vmem:[%s1897_s11 + $0xe0] sm:$0xff] }
  0x2a   : > { %2676 = vst [vmem:[#allocation46_spill] sm:$0xff] %v1978_v40  ;;  %2677 = vst [vmem:[#allocation47_spill] sm:$0xff] %v1981_v41  ;;  %v1987_v43 = vld [vmem:[%s1897_s11 + $0xe8] sm:$0xff]  ;;  %v1990_v44 = vld [vmem:[%s1897_s11 + $0xf0] sm:$0xff] }
  0x2b   : > { %2678 = vst [vmem:[#allocation48_spill] sm:$0xff] %v1984_v42  ;;  %2679 = vst [vmem:[#allocation49_spill] sm:$0xff] %v1987_v43  ;;  %v1993_v45 = vld [vmem:[%s1897_s11 + $0xf8] sm:$0xff]  ;;  %v1996_v46 = vld [vmem:[%s1897_s11 + $0x100] sm:$0xff] }
  0x2c   : > { %2680 = vst [vmem:[#allocation50_spill] sm:$0xff] %v1990_v44  ;;  %2681 = vst [vmem:[#allocation51_spill] sm:$0xff] %v1993_v45  ;;  %v1999_v47 = vld [vmem:[%s1897_s11 + $0x108] sm:$0xff]  ;;  %v2002_v48 = vld [vmem:[%s1897_s11 + $0x110] sm:$0xff] }
  0x2d   : > { %2682 = vst [vmem:[#allocation52_spill] sm:$0xff] %v1996_v46  ;;  %2683 = vst [vmem:[#allocation53_spill] sm:$0xff] %v1999_v47  ;;  %v2005_v49 = vld [vmem:[%s1897_s11 + $0x118] sm:$0xff]  ;;  %v2008_v50 = vld [vmem:[%s1897_s11 + $0x120] sm:$0xff] }
  0x2e   : > { %2684 = vst [vmem:[#allocation54_spill] sm:$0xff] %v2002_v48  ;;  %2685 = vst [vmem:[#allocation55_spill] sm:$0xff] %v2005_v49  ;;  %v2011_v51 = vld [vmem:[%s1897_s11 + $0x128] sm:$0xff]  ;;  %v2014_v52 = vld [vmem:[%s1897_s11 + $0x130] sm:$0xff] }
  0x2f   : > { %2686 = vst [vmem:[#allocation56_spill] sm:$0xff] %v2008_v50  ;;  %2687 = vst [vmem:[#allocation57_spill] sm:$0xff] %v2011_v51  ;;  %v2017_v53 = vld [vmem:[%s1897_s11 + $0x138] sm:$0xff]  ;;  %v2020_v54 = vld [vmem:[%s1897_s11 + $0x140] sm:$0xff] }
  0x30   : > { %2688 = vst [vmem:[#allocation58_spill] sm:$0xff] %v2014_v52  ;;  %2689 = vst [vmem:[#allocation59_spill] sm:$0xff] %v2017_v53  ;;  %v2023_v55 = vld [vmem:[%s1897_s11 + $0x148] sm:$0xff]  ;;  %v2026_v56 = vld [vmem:[%s1897_s11 + $0x150] sm:$0xff] }
  0x31   : > { %2690 = vst [vmem:[#allocation60_spill] sm:$0xff] %v2020_v54  ;;  %2691 = vst [vmem:[#allocation61_spill] sm:$0xff] %v2023_v55  ;;  %v2029_v57 = vld [vmem:[%s1897_s11 + $0x158] sm:$0xff]  ;;  %v2032_v58 = vld [vmem:[%s1897_s11 + $0x160] sm:$0xff] }
  0x32   : > { %2692 = vst [vmem:[#allocation62_spill] sm:$0xff] %v2026_v56  ;;  %2693 = vst [vmem:[#allocation63_spill] sm:$0xff] %v2029_v57  ;;  %v2035_v59 = vld [vmem:[%s1897_s11 + $0x168] sm:$0xff]  ;;  %v2038_v60 = vld [vmem:[%s1897_s11 + $0x170] sm:$0xff] }
  0x33   : > { %2694 = vst [vmem:[#allocation64_spill] sm:$0xff] %v2032_v58  ;;  %2695 = vst [vmem:[#allocation65_spill] sm:$0xff] %v2035_v59  ;;  %v2041_v61 = vld [vmem:[%s1897_s11 + $0x178] sm:$0xff]  ;;  %v2044_v62 = vld [vmem:[%s1897_s11 + $0x180] sm:$0xff] }
  0x34   : > { %2696 = vst [vmem:[#allocation66_spill] sm:$0xff] %v2038_v60  ;;  %v2047_v63 = vld [vmem:[%s1897_s11 + $0x188] sm:$0xff]  ;;  %v2050_v13 = vld [vmem:[%s1897_s11 + $0x190] sm:$0xff]  ;;  %v2053_v12 = vld [vmem:[%s1897_s11 + $0x198] sm:$0xff] }
  0x35   : > { %2697 = vst [vmem:[#allocation67_spill] sm:$0xff] %v2050_v13  ;;  %2698 = vst [vmem:[#allocation68_spill] sm:$0xff] %v2053_v12  ;;  %v2056_v11 = vld [vmem:[%s1897_s11 + $0x1a0] sm:$0xff]  ;;  %v2059_v10 = vld [vmem:[%s1897_s11 + $0x1a8] sm:$0xff] }
  0x36   : > { %2699 = vst [vmem:[#allocation69_spill] sm:$0xff] %v2056_v11  ;;  %2700 = vst [vmem:[#allocation70_spill] sm:$0xff] %v2059_v10  ;;  %v2062_v9 = vld [vmem:[%s1897_s11 + $0x1b0] sm:$0xff]  ;;  %v2065_v8 = vld [vmem:[%s1897_s11 + $0x1b8] sm:$0xff] }
  0x37   : > { %2701 = vst [vmem:[#allocation71_spill] sm:$0xff] %v2062_v9  ;;  %2702 = vst [vmem:[#allocation72_spill] sm:$0xff] %v2065_v8  ;;  %v2068_v7 = vld [vmem:[%s1897_s11 + $0x1c0] sm:$0xff]  ;;  %v2071_v6 = vld [vmem:[%s1897_s11 + $0x1c8] sm:$0xff] }
  0x38   : > { %2703 = vst [vmem:[#allocation73_spill] sm:$0xff] %v2068_v7  ;;  %2704 = vst [vmem:[#allocation74_spill] sm:$0xff] %v2071_v6  ;;  %v2074_v5 = vld [vmem:[%s1897_s11 + $0x1d0] sm:$0xff]  ;;  %v2077_v4 = vld [vmem:[%s1897_s11 + $0x1d8] sm:$0xff] }
  0x39   : > { %2705 = vst [vmem:[#allocation75_spill] sm:$0xff] %v2074_v5  ;;  %2706 = vst [vmem:[#allocation76_spill] sm:$0xff] %v2077_v4  ;;  %v2080_v3 = vld [vmem:[%s1897_s11 + $0x1e0] sm:$0xff]  ;;  %v2083_v2 = vld [vmem:[%s1897_s11 + $0x1e8] sm:$0xff] }
  0x3a   : > { %2707 = vst [vmem:[#allocation77_spill] sm:$0xff] %v2080_v3  ;;  %2708 = vst [vmem:[#allocation78_spill] sm:$0xff] %v2083_v2  ;;  %v2086_v1 = vld [vmem:[%s1897_s11 + $0x1f0] sm:$0xff]  ;;  %v2089_v46 = vld [vmem:[%s1897_s11 + $0x1f8] sm:$0xff] }
  0x3b   : > { %2709 = vst [vmem:[#allocation79_spill] sm:$0xff] %v2086_v1  ;;  %2710 = vst [vmem:[#allocation80_spill] sm:$0xff] %v2089_v46 }
  0x3c LB: >> { %v2711_v0 = vld [vmem:[#allocation6_spill] sm:$0xff]  ;;  %vm411_vm0 = vcmask 261120   ;;  %v2712_v45 = vld [vmem:[#allocation51_spill] sm:$0xff]  ;;  %s331_s14 = smul.u32 104, %s1731_s12  ;;  %v2719_v43 = vld [vmem:[#allocation49_spill] sm:$0xff]  ;;  %vm981_vm1 = vcmask 850944   ;;  %s1731_s12 = sphi %s2094_s12, %s330_s12  }
  0x3d   : >> { %1383 = vmatprep.subr.msk.mxu0 %vm411_vm0, %v2712_v45  ;;  %v2714_v29 = vld [vmem:[#allocation35_spill] sm:$0xff]  ;;  %v2715_v44 = vld [vmem:[#allocation50_spill] sm:$0xff]  ;;  %1415 = vmatprep.mubr.msk.f32.mxu0 %vm411_vm0, %v2711_v0  ;;  %v2721_v27 = vld [vmem:[#allocation33_spill] sm:$0xff]  ;;  %s1160_s17 = sshra.s32 %s1731_s12, 2  ;;  %s1163_s18 = sand.u32 3, %s1731_s12 }
  0x3e   : >> { %1384 = vmatpush3.xpose.msk.msra.mxu0 %vm411_vm0, %v2714_v29  ;;  %1473 = vmatprep.mubr.msk.f32.mxu1 %vm411_vm0, %v2711_v0  ;;  %s2119_s16 = scalar_lea.vmem %s2602_s0, %s331_s14  ;;  %v1733_v29 = vmov 0   ;;  %v2717_v28 = vld [vmem:[#allocation34_spill] sm:$0xff]  ;;  %v2722_v59 = vld [vmem:[#allocation65_spill] sm:$0xff]  ;;  %v2723_v42 = vld [vmem:[#allocation48_spill] sm:$0xff]  ;;  %s1381_s19 = sshll.u32 %s1160_s17, 4 }
  0x3f   : >> { %1385 = vmatprep.subr.msk.mxu0 %vm411_vm0, %v2715_v44  ;;  %1549 = vset.pattern.permute.xlu0 %v1733_v29  ;;  %v345_v44 = vld [vmem:[%s2119_s16 + $0x60] sm:$0xff]  ;;  %v344_v45 = vld [vmem:[%s2119_s16 + $0x58] sm:$0xff]  ;;  %v2725_v26 = vld [vmem:[#allocation32_spill] sm:$0xff]  ;;  %s1166_s24 = sadd.s32 %s1381_s19, %s1163_s18  ;;  %s330_s12 = sadd.s32 1, %s1731_s12  }
  0x40   : >> { %1550 = vset.pattern.permute.xlu1 %v1733_v29  ;;  %v2718_v60 = vld [vmem:[#allocation66_spill] sm:$0xff]  ;;  %408 = vperm.xlu0 %1549, %v345_v44   ;;  %v342_v29 = vld [vmem:[%s2119_s16 + $0x48] sm:$0xff]  ;;  %v2726_v58 = vld [vmem:[#allocation64_spill] sm:$0xff]  ;;  %s1167_s26 = scalar_lea.vmem %s2092_s7, %s1166_s24 [#allocation3]  ;;  %p327_p11 = scmp.ge.s32.totalorder %s330_s12, 4  }
  0x41   : >> { %v2720_v2 = vld [vmem:[#allocation78_spill] sm:$0xff]  ;;  %v2724_v3 = vld [vmem:[#allocation77_spill] sm:$0xff]  ;;  %v2727_v41 = vld [vmem:[#allocation47_spill] sm:$0xff]  ;;  %s1171_s27 = sld [smem:[#allocation2]] (%p327_p11)  ;;  %s1382_s8 = sshll.u32 (%p327_p11), %s1791_s4, 8 }
  0x42   : >> { %v2713_v46 = vld [vmem:[#allocation80_spill] sm:$0xff]  ;;  %v2716_v1 = vld [vmem:[#allocation79_spill] sm:$0xff]  ;;  %1386 = vmatpush3.xpose.msk.msra.mxu0 %vm411_vm0, %v2717_v28  ;;  %v341_v44 = vld [vmem:[%s2119_s16 + $0x40] sm:$0xff]  ;;  %s1204_s9 = sshll.u32 (%p327_p11), %s2092_s7, 4  ;;  %s2557_s12 = scalar_lea.hbm (%p327_p11), %s2607_s5, %s1382_s8  ;;  %s2559_s9 = int_to_ptr.vmem [resolvable:$true] %s1204_s9 }
  0x43   : >> { %1441 = vmatprep.subr.msk.mxu1 %vm411_vm0, %v2713_v46  ;;  %1387 = vmatprep.subr.msk.mxu0 %vm411_vm0, %v2719_v43  ;;  %v2728_v4 = vld [vmem:[#allocation76_spill] sm:$0xff]  ;;  %v2729_v25 = vld [vmem:[#allocation31_spill] sm:$0xff]  ;;  %v2731_v40 = vld [vmem:[#allocation46_spill] sm:$0xff]  ;;  %s1190_s14 = scalar_lea.sflag (%p327_p11), [#allocation4], %s229_s6  ;;  %s1663_s13 = scalar_lea.vmem (%p327_p11), %s2559_s9, 256 }
  0x44   : >> { %1442 = vmatpush3.xpose.msk.msra.mxu1 %vm411_vm0, %v2041_v61  ;;  %403 = vperm.xlu0 %1549, %v344_v45   ;;  %v339_v45 = vld [vmem:[%s2119_s16 + $0x30] sm:$0xff]  ;;  %v2730_v57 = vld [vmem:[#allocation63_spill] sm:$0xff]  ;;  %v2733_v24 = vld [vmem:[#allocation30_spill] sm:$0xff]  ;;  %p1664_p12 = scmp.ne.s32.totalorder (%p327_p11), %s2559_s9, %s1663_s13  ;;  %s1736_s4 = smov (%p327_p11), [#allocation3]  }
  0x45   : >> { %1443 = vmatprep.subr.msk.mxu1 %vm411_vm0, %v2716_v1  ;;  %v343_v1 = vld [vmem:[%s2119_s16 + $0x50] sm:$0xff]  ;;  %v2732_v5 = vld [vmem:[#allocation75_spill] sm:$0xff]  ;;  %v2734_v56 = vld [vmem:[#allocation62_spill] sm:$0xff]  ;;  %s1667_s15 = sshll.u32 (%p327_p11), %s1736_s4, 4  ;;  %s1668_s15 = int_to_ptr.vmem [resolvable:$false] %s1667_s15 }
  0x46   : >> { %398 = vperm.xlu1 %1550, %v343_v1   ;;  %1388 = vmatpush3.xpose.msk.msra.mxu0 %vm411_vm0, %v2721_v27  ;;  %v340_v1 = vld [vmem:[%s2119_s16 + $0x38] sm:$0xff]  ;;  %v2736_v6 = vld [vmem:[#allocation74_spill] sm:$0xff]  ;;  %v2739_v38 = vld [vmem:[#allocation44_spill] sm:$0xff]  ;;  %p1665_p13 = pnand (%p327_p11), %p1664_p12, %p1808_p5  ;;  %p1670_p1 = scmp.lt.s32.totalorder (%p327_p11), %s2559_s9, %s1668_s15 }
  0x47   : >> { %1389 = vmatprep.subr.msk.mxu0 %vm411_vm0, %v2723_v42  ;;  %v2735_v39 = vld [vmem:[#allocation45_spill] sm:$0xff]  ;;  %v2741_v22 = vld [vmem:[#allocation28_spill] sm:$0xff]  ;;  %v2743_v37 = vld [vmem:[#allocation43_spill] sm:$0xff] }
  0x48   : >> { %1444 = vmatpush3.xpose.msk.msra.mxu1 %vm411_vm0, %v2718_v60  ;;  %388 = vperm.xlu0 %1549, %v341_v44   ;;  %v337_v44 = vld [vmem:[%s2119_s16 + $0x20] sm:$0xff]  ;;  %v2737_v23 = vld [vmem:[#allocation29_spill] sm:$0xff]  ;;  %v2742_v54 = vld [vmem:[#allocation60_spill] sm:$0xff]  ;;  %p1666_p0 = pneg (%p327_p11), %p1665_p13 }
  0x49   : >> { %1445 = vmatprep.subr.msk.mxu1 %vm411_vm0, %v2720_v2  ;;  %v335_v2 = vld [vmem:[%s2119_s16 + $0x10] sm:$0xff]  ;;  %v2738_v55 = vld [vmem:[#allocation61_spill] sm:$0xff]  ;;  %v2745_v21 = vld [vmem:[#allocation27_spill] sm:$0xff] }
  0x4a   : >> { %393 = vperm.xlu1 %1550, %v342_v29   ;;  %1390 = vmatpush3.xpose.msk.msra.mxu0 %vm411_vm0, %v2725_v26  ;;  %v338_v29 = vld [vmem:[%s2119_s16 + $0x28] sm:$0xff]  ;;  %v2740_v7 = vld [vmem:[#allocation73_spill] sm:$0xff]  ;;  %v2744_v8 = vld [vmem:[#allocation72_spill] sm:$0xff] }
  0x4b   : >> { %1391 = vmatprep.subr.msk.mxu0 %vm411_vm0, %v2727_v41  ;;  %v2746_v53 = vld [vmem:[#allocation59_spill] sm:$0xff]  ;;  %v2747_v36 = vld [vmem:[#allocation42_spill] sm:$0xff]  ;;  %v2751_v35 = vld [vmem:[#allocation41_spill] sm:$0xff] }
  0x4c   : >> { %1446 = vmatpush3.xpose.msk.msra.mxu1 %vm411_vm0, %v2722_v59  ;;  %378 = vperm.xlu0 %1549, %v339_v45   ;;  %v334_v45 = vld [vmem:[%s2119_s16 + $0x8] sm:$0xff]  ;;  %v2749_v20 = vld [vmem:[#allocation26_spill] sm:$0xff]  ;;  %v2753_v19 = vld [vmem:[#allocation25_spill] sm:$0xff] }
  0x4d   : >> { %1447 = vmatprep.subr.msk.mxu1 %vm411_vm0, %v2724_v3  ;;  %v2748_v9 = vld [vmem:[#allocation71_spill] sm:$0xff]  ;;  %v2750_v52 = vld [vmem:[#allocation58_spill] sm:$0xff]  ;;  %v2754_v51 = vld [vmem:[#allocation57_spill] sm:$0xff] }
  0x4e   : >> { %383 = vperm.xlu1 %1550, %v340_v1   ;;  %1392 = vmatpush3.xpose.msk.msra.mxu0 %vm411_vm0, %v2729_v25  ;;  %v336_v1 = vld [vmem:[%s2119_s16 + $0x18] sm:$0xff]  ;;  %v2752_v10 = vld [vmem:[#allocation70_spill] sm:$0xff]  ;;  %v2755_v34 = vld [vmem:[#allocation40_spill] sm:$0xff] }
  0x4f   : >> { %1393 = vmatprep.subr.msk.mxu0 %vm411_vm0, %v2731_v40  ;;  %v2756_v11 = vld [vmem:[#allocation69_spill] sm:$0xff]  ;;  %v2757_v18 = vld [vmem:[#allocation24_spill] sm:$0xff]  ;;  %v2759_v33 = vld [vmem:[#allocation39_spill] sm:$0xff] }
  0x50   : >> { %1448 = vmatpush3.xpose.msk.msra.mxu1 %vm411_vm0, %v2726_v58  ;;  %368 = vperm.xlu0 %1549, %v337_v44   ;;  %v2758_v50 = vld [vmem:[#allocation56_spill] sm:$0xff]  ;;  %v2761_v17 = vld [vmem:[#allocation23_spill] sm:$0xff]  ;;  %v2763_v32 = vld [vmem:[#allocation38_spill] sm:$0xff] }
  0x51   : >> { %1449 = vmatprep.subr.msk.mxu1 %vm411_vm0, %v2728_v4  ;;  %v2760_v12 = vld [vmem:[#allocation68_spill] sm:$0xff]  ;;  %v2762_v49 = vld [vmem:[#allocation55_spill] sm:$0xff]  ;;  %v2765_v16 = vld [vmem:[#allocation22_spill] sm:$0xff] }
  0x52   : >> { %373 = vperm.xlu1 %1550, %v338_v29   ;;  %1394 = vmatpush3.xpose.msk.msra.mxu0 %vm411_vm0, %v2733_v24  ;;  %v333_v29 = vld [vmem:[%s2119_s16] sm:$0xff]  ;;  %v2764_v13 = vld [vmem:[#allocation67_spill] sm:$0xff]  ;;  %v2767_v31 = vld [vmem:[#allocation37_spill] sm:$0xff]  ;;  %s1669_s16 = scalar_lea.vmem (%p327_p11), %s1668_s15, 512 }
  0x53   : >> { %1395 = vmatprep.subr.msk.mxu0 %vm411_vm0, %v2735_v39  ;;  %v2766_v48 = vld [vmem:[#allocation54_spill] sm:$0xff]  ;;  %v2768_v15 = vld [vmem:[#allocation21_spill] sm:$0xff]  ;;  %v2770_v30 = vld [vmem:[#allocation36_spill] sm:$0xff]  ;;  %p1671_p2 = scmp.lt.s32.totalorder (%p327_p11), %s1669_s16, %s1663_s13 }
  0x54   : >> { %1450 = vmatpush3.xpose.msk.msra.mxu1 %vm411_vm0, %v2730_v57  ;;  %358 = vperm.xlu0 %1549, %v335_v2   ;;  %v2769_v47 = vld [vmem:[#allocation53_spill] sm:$0xff]  ;;  %v2771_v14 = vld [vmem:[#allocation20_spill] sm:$0xff]  ;;  %v2773_v44 = vld [vmem:[#allocation7_spill] sm:$0xff] }
  0x55   : >> { %1451 = vmatprep.subr.msk.mxu1 %vm411_vm0, %v2732_v5  ;;  %v2772_v2 = vld [vmem:[#allocation52_spill] sm:$0xff]  ;;  %p1672_p3 = por (%p327_p11), %p1671_p2, %p1670_p1 }
  0x56   : >> { %363 = vperm.xlu1 %1550, %v336_v1   ;;  %1396 = vmatpush3.xpose.msk.msra.mxu0 %vm411_vm0, %v2737_v23  ;;  %v2774_v1 = vld [vmem:[#allocation8_spill] sm:$0xff] }
  0x57   : >> { %1397 = vmatprep.subr.msk.mxu0 %vm411_vm0, %v2739_v38  ;;  %p1673_p4 = pnand (%p327_p11), %p1672_p3, %p1666_p0 }
  0x58   : >> { %1452 = vmatpush3.xpose.msk.msra.mxu1 %vm411_vm0, %v2734_v56  ;;  %348 = vperm.xlu0 %1549, %v333_v29   ;;  %v2776_v29 = vld [vmem:[#allocation10_spill] sm:$0xff] }
  0x59   : >> { %1453 = vmatprep.subr.msk.mxu1 %vm411_vm0, %v2736_v6 }
  0x5a   : >> { %353 = vperm.xlu1 %1550, %v334_v45   ;;  %1398 = vmatpush3.xpose.msk.msra.mxu0 %vm411_vm0, %v2741_v22  ;;  %v2775_v45 = vld [vmem:[#allocation9_spill] sm:$0xff] }
  0x5b   : >> { %1399 = vmatprep.subr.msk.mxu0 %vm411_vm0, %v2743_v37 }
  0x5c   : >> { %1454 = vmatpush3.xpose.msk.msra.mxu1 %vm411_vm0, %v2738_v55 }
  0x5d   : >> { %1455 = vmatprep.subr.msk.mxu1 %vm411_vm0, %v2740_v7 }
  0x5e   : >> { %1400 = vmatpush3.xpose.msk.msra.mxu0 %vm411_vm0, %v2745_v21 }
  0x5f   : >> { %1401 = vmatprep.subr.msk.mxu0 %vm411_vm0, %v2747_v36 }
  0x60   : >> { %1456 = vmatpush3.xpose.msk.msra.mxu1 %vm411_vm0, %v2742_v54 }
  0x61   : >> { %1457 = vmatprep.subr.msk.mxu1 %vm411_vm0, %v2744_v8 }
  0x62   : >> { %1402 = vmatpush3.xpose.msk.msra.mxu0 %vm411_vm0, %v2749_v20 }
  0x63   : >> { %1403 = vmatprep.subr.msk.mxu0 %vm411_vm0, %v2751_v35 }
  0x64   : >> { %1458 = vmatpush3.xpose.msk.msra.mxu1 %vm411_vm0, %v2746_v53 }
  0x65   : >> { %1459 = vmatprep.subr.msk.mxu1 %vm411_vm0, %v2748_v9 }
  0x66   : >> { %1404 = vmatpush3.xpose.msk.msra.mxu0 %vm411_vm0, %v2753_v19 }
  0x67   : >> { %1405 = vmatprep.subr.msk.mxu0 %vm411_vm0, %v2755_v34 }
  0x68   : >> { %1460 = vmatpush3.xpose.msk.msra.mxu1 %vm411_vm0, %v2750_v52 }
  0x69   : >> { %1461 = vmatprep.subr.msk.mxu1 %vm411_vm0, %v2752_v10 }
  0x6a   : >> { %1406 = vmatpush3.xpose.msk.msra.mxu0 %vm411_vm0, %v2757_v18 }
  0x6b   : >> { %1407 = vmatprep.subr.msk.mxu0 %vm411_vm0, %v2759_v33 }
  0x6c   : >> { %1462 = vmatpush3.xpose.msk.msra.mxu1 %vm411_vm0, %v2754_v51 }
  0x6d   : >> { %1463 = vmatprep.subr.msk.mxu1 %vm411_vm0, %v2756_v11 }
  0x6e   : >> { %1408 = vmatpush3.xpose.msk.msra.mxu0 %vm411_vm0, %v2761_v17 }
  0x6f   : >> { %1409 = vmatprep.subr.msk.mxu0 %vm411_vm0, %v2763_v32 }
  0x70   : >> { %1464 = vmatpush3.xpose.msk.msra.mxu1 %vm411_vm0, %v2758_v50 }
  0x71   : >> { %1465 = vmatprep.subr.msk.mxu1 %vm411_vm0, %v2760_v12 }
  0x72   : >> { %1410 = vmatpush3.xpose.msk.msra.mxu0 %vm411_vm0, %v2765_v16 }
  0x73   : >> { %1411 = vmatprep.subr.msk.mxu0 %vm411_vm0, %v2767_v31 }
  0x74   : >> { %1466 = vmatpush3.xpose.msk.msra.mxu1 %vm411_vm0, %v2762_v49 }
  0x75   : >> { %1467 = vmatprep.subr.msk.mxu1 %vm411_vm0, %v2764_v13 }
  0x76   : >> { %1412 = vmatpush3.xpose.msk.msra.mxu0 %vm411_vm0, %v2768_v15 }
  0x77   : >> { %1413 = vmatprep.subr.msk.mxu0 %vm411_vm0, %v2770_v30 }
  0x78   : >> { %1468 = vmatpush3.xpose.msk.msra.mxu1 %vm411_vm0, %v2766_v48 }
  0x79   : >> { %1469 = vmatprep.subr.msk.mxu1 %vm411_vm0, %v2047_v63 }
  0x7a   : >> { %1414 = vmatpush3.xpose.msk.msra.mxu0 %vm411_vm0, %v2771_v14 }
  0x7c   : >> { %1470 = vmatpush3.xpose.msk.msra.mxu1 %vm411_vm0, %v2769_v47 }
  0x7d   : >> { %1471 = vmatprep.subr.msk.mxu1 %vm411_vm0, %v2044_v62  ;;  %1416 = vmatmul.mubr.msk.f32.vlgmr.msra.gmra.mxu0 %vm411_vm0, %v2711_v0 }
  0x7e   : >> { %1417 = vmatprep.mubr.msk.f32.mxu0 %vm411_vm0, %v2773_v44 }
  0x80   : >> { %1472 = vmatpush3.xpose.msk.msra.mxu1 %vm411_vm0, %v2772_v2  ;;  %v2777_v2 = vld [vmem:[#allocation11_spill] sm:$0xff] }
  0x81   : >> { %1418 = vmatmul.mubr.msk.f32.gmra.mxu0 %vm411_vm0, %v2773_v44 }
  0x82   : >> { %1419 = vmatprep.mubr.msk.f32.mxu0 %vm411_vm0, %v2774_v1 }
  0x83   : >> { %1474 = vmatmul.mubr.msk.f32.vlgmr.msra.gmra.mxu1 %vm411_vm0, %v2711_v0  ;;  %v2778_v0 = vld [vmem:[#allocation12_spill] sm:$0xff] }
  0x84   : >> { %1475 = vmatprep.mubr.msk.f32.mxu1 %vm411_vm0, %v2773_v44 }
  0x85   : >> { %1420 = vmatmul.mubr.msk.f32.gmra.mxu0 %vm411_vm0, %v2774_v1 }
  0x86   : >> { %1421 = vmatprep.mubr.msk.f32.mxu0 %vm411_vm0, %v2775_v45 }
  0x87   : >> { %1476 = vmatmul.mubr.msk.f32.gmra.mxu1 %vm411_vm0, %v2773_v44 }
  0x88   : >> { %1477 = vmatprep.mubr.msk.f32.mxu1 %vm411_vm0, %v2774_v1 }
  0x89   : >> { %1422 = vmatmul.mubr.msk.f32.gmra.mxu0 %vm411_vm0, %v2775_v45 }
  0x8a   : >> { %1423 = vmatprep.mubr.msk.f32.mxu0 %vm411_vm0, %v2776_v29 }
  0x8b   : >> { %1478 = vmatmul.mubr.msk.f32.gmra.mxu1 %vm411_vm0, %v2774_v1  ;;  %v2779_v1 = vld [vmem:[#allocation13_spill] sm:$0xff] }
  0x8c   : >> { %1479 = vmatprep.mubr.msk.f32.mxu1 %vm411_vm0, %v2775_v45 }
  0x8d   : >> { %1424 = vmatmul.mubr.msk.f32.gmra.mxu0 %vm411_vm0, %v2776_v29 }
  0x8e   : >> { %1425 = vmatprep.mubr.msk.f32.mxu0 %vm411_vm0, %v2777_v2 }
  0x8f   : >> { %1480 = vmatmul.mubr.msk.f32.gmra.mxu1 %vm411_vm0, %v2775_v45 }
  0x90   : >> { %1481 = vmatprep.mubr.msk.f32.mxu1 %vm411_vm0, %v2776_v29 }
  0x91   : >> { %1426 = vmatmul.mubr.msk.f32.gmra.mxu0 %vm411_vm0, %v2777_v2 }
  0x92   : >> { %1427 = vmatprep.mubr.msk.f32.mxu0 %vm411_vm0, %v2778_v0 }
  0x93   : >> { %1482 = vmatmul.mubr.msk.f32.gmra.mxu1 %vm411_vm0, %v2776_v29 }
  0x94   : >> { %1483 = vmatprep.mubr.msk.f32.mxu1 %vm411_vm0, %v2777_v2 }
  0x95   : >> { %1428 = vmatmul.mubr.msk.f32.gmra.mxu0 %vm411_vm0, %v2778_v0 }
  0x96   : >> { %1429 = vmatprep.mubr.msk.f32.mxu0 %vm411_vm0, %v2779_v1 }
  0x97   : >> { %1484 = vmatmul.mubr.msk.f32.gmra.mxu1 %vm411_vm0, %v2777_v2  ;;  %v2780_v2 = vld [vmem:[#allocation14_spill] sm:$0xff] }
  0x98   : >> { %1485 = vmatprep.mubr.msk.f32.mxu1 %vm411_vm0, %v2778_v0 }
  0x99   : >> { %1430 = vmatmul.mubr.msk.f32.gmra.mxu0 %vm411_vm0, %v2779_v1 }
  0x9a   : >> { %1431 = vmatprep.mubr.msk.f32.mxu0 %vm411_vm0, %v2780_v2 }
  0x9b   : >> { %1486 = vmatmul.mubr.msk.f32.gmra.mxu1 %vm411_vm0, %v2778_v0  ;;  %v2781_v0 = vld [vmem:[#allocation15_spill] sm:$0xff] }
  0x9c   : >> { %1487 = vmatprep.mubr.msk.f32.mxu1 %vm411_vm0, %v2779_v1 }
  0x9d   : >> { %1432 = vmatmul.mubr.msk.f32.gmra.mxu0 %vm411_vm0, %v2780_v2 }
  0x9e   : >> { %1433 = vmatprep.mubr.msk.f32.mxu0 %vm411_vm0, %v2781_v0 }
  0x9f   : >> { %1488 = vmatmul.mubr.msk.f32.gmra.mxu1 %vm411_vm0, %v2779_v1  ;;  %v2782_v1 = vld [vmem:[#allocation16_spill] sm:$0xff] }
  0xa0   : >> { %1489 = vmatprep.mubr.msk.f32.mxu1 %vm411_vm0, %v2780_v2 }
  0xa1   : >> { %1434 = vmatmul.mubr.msk.f32.gmra.mxu0 %vm411_vm0, %v2781_v0 }
  0xa2   : >> { %1435 = vmatprep.mubr.msk.f32.mxu0 %vm411_vm0, %v2782_v1 }
  0xa3   : >> { %1490 = vmatmul.mubr.msk.f32.gmra.mxu1 %vm411_vm0, %v2780_v2  ;;  %v2783_v2 = vld [vmem:[#allocation17_spill] sm:$0xff] }
  0xa4   : >> { %1491 = vmatprep.mubr.msk.f32.mxu1 %vm411_vm0, %v2781_v0 }
  0xa5   : >> { %1436 = vmatmul.mubr.msk.f32.gmra.mxu0 %vm411_vm0, %v2782_v1 }
  0xa6   : >> { %1437 = vmatprep.mubr.msk.f32.mxu0 %vm411_vm0, %v2783_v2 }
  0xa7   : >> { %1492 = vmatmul.mubr.msk.f32.gmra.mxu1 %vm411_vm0, %v2781_v0  ;;  %v2784_v0 = vld [vmem:[#allocation18_spill] sm:$0xff] }
  0xa8   : >> { %1493 = vmatprep.mubr.msk.f32.mxu1 %vm411_vm0, %v2782_v1 }
  0xa9   : >> { %1438 = vmatmul.mubr.msk.f32.gmra.mxu0 %vm411_vm0, %v2783_v2 }
  0xaa   : >> { %1439 = vmatprep.mubr.msk.f32.mxu0 %vm411_vm0, %v2784_v0 }
  0xab   : >> { %1494 = vmatmul.mubr.msk.f32.gmra.mxu1 %vm411_vm0, %v2782_v1  ;;  %v1734_v1 = vmov 0.0  }
  0xac   : >> { %1495 = vmatprep.mubr.msk.f32.mxu1 %vm411_vm0, %v2783_v2 }
  0xad   : >> { %1440 = vmatmul.mubr.msk.f32.gmra.mxu0 %vm411_vm0, %v2784_v0 }
  0xae   : >> { %1049 = vmatprep.mubr.f32.mxu0 %v1734_v1 }
  0xaf   : >> { %1496 = vmatmul.mubr.msk.f32.gmra.mxu1 %vm411_vm0, %v2783_v2 }
  0xb0   : >> { %1497 = vmatprep.mubr.msk.f32.mxu1 %vm411_vm0, %v2784_v0 }
  0xb3   : >> { %1498 = vmatmul.mubr.msk.f32.gmra.mxu1 %vm411_vm0, %v2784_v0 }
  0xb4   : >> { %1120 = vmatprep.mubr.f32.mxu1 %v1734_v1 }
  0xbb   : >> { %v2350_v3 = vpop.permute.xlu0 %408 }
  0xbf   : >> { %v2352_v4 = vpop.permute.xlu0 %403 }
  0xc1   : >> { %v2354_v2 = vpop.permute.xlu1 %398 }
  0xc3   : >> { %v2356_v5 = vpop.permute.xlu0 %388 }
  0xc5   : >> { %v2358_v6 = vpop.permute.xlu1 %393 }
  0xc7   : >> { %v2364_v0 = vpop.permute.xlu0 %378 }
  0xc9   : >> { %v2368_v12 = vpop.permute.xlu1 %383 }
  0xcb   : >> { %v2374_v17 = vpop.permute.xlu0 %368 }
  0xcd   : >> { %v2378_v20 = vpop.permute.xlu1 %373 }
  0xcf   : >> { %v2384_v25 = vpop.permute.xlu0 %358 }
  0xd1   : >> { %v2388_v28 = vpop.permute.xlu1 %363 }
  0xd3   : >> { %v2394_v33 = vpop.permute.xlu0 %348 }
  0xd5   : >> { %v2398_v36 = vpop.permute.xlu1 %353 }
 0x13d   : >> { %v709_v7 = vpop.f32.mrf.mxu0 }
 0x13e   : >> { %v710_v37 = vadd.f32 %v709_v7, %v2394_v33 }
 0x13f   : >> { %v711_v9 = vpop.f32.mrf.mxu0 }
 0x140   : >> { %v712_v40 = vadd.f32 %v711_v9, %v2394_v33  ;;  %1551 = vtanh.f32 %v710_v37 }
 0x141   : >> { %v715_v11 = vpop.f32.mrf.mxu0 }
 0x142   : >> { %v716_v41 = vadd.f32 %v715_v11, %v2398_v36  ;;  %1553 = vtanh.f32 %v712_v40 }
 0x143   : >> { %v2360_v8 = vpop.f32.mrf.mxu1  ;;  %v717_v13 = vpop.f32.mrf.mxu0 }
 0x144   : >> { %v718_v44 = vadd.f32 %v717_v13, %v2398_v36  ;;  %1555 = vtanh.f32 %v716_v41 }
 0x145   : >> { %v2362_v10 = vpop.f32.mrf.mxu1  ;;  %v721_v15 = vpop.f32.mrf.mxu0 }
 0x146   : >> { %v722_v45 = vadd.f32 %v721_v15, %v2384_v25  ;;  %1557 = vtanh.f32 %v718_v44 }
 0x147   : >> { %v2366_v1 = vpop.f32.mrf.mxu1  ;;  %v723_v18 = vpop.f32.mrf.mxu0 }
 0x148   : >> { %v724_v7 = vadd.f32 %v723_v18, %v2384_v25  ;;  %1559 = vtanh.f32 %v722_v45 }
 0x149   : >> { %v2370_v14 = vpop.f32.mrf.mxu1  ;;  %v727_v21 = vpop.f32.mrf.mxu0 }
 0x14a   : >> { %v728_v48 = vadd.f32 %v727_v21, %v2388_v28  ;;  %1561 = vtanh.f32 %v724_v7 }
 0x14b   : >> { %v2372_v16 = vpop.f32.mrf.mxu1  ;;  %v729_v23 = vpop.f32.mrf.mxu0 }
 0x14c   : >> { %v730_v11 = vadd.f32 %v729_v23, %v2388_v28  ;;  %1563 = vtanh.f32 %v728_v48 }
 0x14d   : >> { %v2376_v19 = vpop.f32.mrf.mxu1  ;;  %v733_v26 = vpop.f32.mrf.mxu0 }
 0x14e   : >> { %v734_v13 = vadd.f32 %v733_v26, %v2374_v17  ;;  %1565 = vtanh.f32 %v730_v11  ;;  %v2433_v50 = vpop.eup %1551 }
 0x14f   : >> { %v2380_v22 = vpop.f32.mrf.mxu1  ;;  %v735_v29 = vpop.f32.mrf.mxu0 }
 0x150   : >> { %v736_v40 = vadd.f32 %v735_v29, %v2374_v17  ;;  %1567 = vtanh.f32 %v734_v13 }
 0x151   : >> { %v2382_v24 = vpop.f32.mrf.mxu1  ;;  %v739_v31 = vpop.f32.mrf.mxu0 }
 0x152   : >> { %v740_v18 = vadd.f32 %v739_v31, %v2378_v20  ;;  %1569 = vtanh.f32 %v736_v40 }
 0x153   : >> { %v2386_v27 = vpop.f32.mrf.mxu1  ;;  %v741_v34 = vpop.f32.mrf.mxu0 }
 0x154   : >> { %v742_v44 = vadd.f32 %v741_v34, %v2378_v20  ;;  %1571 = vtanh.f32 %v740_v18 }
 0x155   : >> { %v2390_v30 = vpop.f32.mrf.mxu1  ;;  %v745_v38 = vpop.f32.mrf.mxu0 }
 0x156   : >> { %v746_v23 = vadd.f32 %v745_v38, %v2364_v0  ;;  %1573 = vtanh.f32 %v742_v44 }
 0x157   : >> { %v2392_v32 = vpop.f32.mrf.mxu1  ;;  %v747_v42 = vpop.f32.mrf.mxu0 }
 0x158   : >> { %v748_v7 = vadd.f32 %v747_v42, %v2364_v0  ;;  %1575 = vtanh.f32 %v746_v23  ;;  %v2436_v42 = vpop.eup %1553 }
 0x159   : >> { %v2396_v35 = vpop.f32.mrf.mxu1  ;;  %v751_v46 = vpop.f32.mrf.mxu0 }
 0x15a   : >> { %v752_v48 = vadd.f32 %v751_v46, %v2368_v12  ;;  %1577 = vtanh.f32 %v748_v7  ;;  %v2439_v44 = vpop.eup %1555 }
 0x15b   : >> { %v2401_v39 = vpop.f32.mrf.mxu1  ;;  %v753_v9 = vpop.f32.mrf.mxu0 }
 0x15c   : >> { %v754_v11 = vadd.f32 %v753_v9, %v2368_v12  ;;  %1579 = vtanh.f32 %v752_v48 }
 0x15d   : >> { %v2405_v43 = vpop.f32.mrf.mxu1  ;;  %v757_v37 = vpop.f32.mrf.mxu0 }
 0x15e   : >> { %v758_v34 = vadd.f32 %v757_v37, %v2356_v5  ;;  %1581 = vtanh.f32 %v754_v11  ;;  %v2442_v37 = vpop.eup %1557 }
 0x15f   : >> { %v2409_v47 = vpop.f32.mrf.mxu1  ;;  %v759_v41 = vpop.f32.mrf.mxu0 }
 0x160   : >> { %v760_v40 = vadd.f32 %v759_v41, %v2356_v5  ;;  %1583 = vtanh.f32 %v758_v34  ;;  %v2445_v41 = vpop.eup %1559 }
 0x161   : >> { %v2413_v49 = vpop.f32.mrf.mxu1  ;;  %v763_v45 = vpop.f32.mrf.mxu0 }
 0x162   : >> { %v764_v46 = vadd.f32 %v763_v45, %v2358_v6  ;;  %1585 = vtanh.f32 %v760_v40  ;;  %v2448_v45 = vpop.eup %1561 }
 0x163   : >> { %v2417_v15 = vpop.f32.mrf.mxu1  ;;  %v765_v29 = vpop.f32.mrf.mxu0 }
 0x164   : >> { %v766_v9 = vadd.f32 %v765_v29, %v2358_v6  ;;  %1587 = vtanh.f32 %v764_v46  ;;  %v2451_v29 = vpop.eup %1563 }
 0x165   : >> { %v2421_v21 = vpop.f32.mrf.mxu1  ;;  %v769_v13 = vpop.f32.mrf.mxu0 }
 0x166   : >> { %v770_v23 = vadd.f32 %v769_v13, %v2354_v2  ;;  %1589 = vtanh.f32 %v766_v9  ;;  %v2454_v13 = vpop.eup %1565 }
 0x167   : >> { %v2425_v26 = vpop.f32.mrf.mxu1  ;;  %v771_v18 = vpop.f32.mrf.mxu0 }
 0x168   : >> { %v772_v48 = vadd.f32 %v771_v18, %v2354_v2  ;;  %1591 = vtanh.f32 %v770_v23  ;;  %v2456_v40 = vpop.eup %1567 }
 0x169   : >> { %v2429_v31 = vpop.f32.mrf.mxu1  ;;  %v775_v7 = vpop.f32.mrf.mxu0 }
 0x16a   : >> { %v776_v53 = vadd.f32 %v775_v7, %v2352_v4  ;;  %1593 = vtanh.f32 %v772_v48  ;;  %v2459_v46 = vpop.eup %1569 }
 0x16b   : >> { %v912_v38 = vpop.f32.mrf.mxu1  ;;  %v777_v11 = vpop.f32.mrf.mxu0 }
 0x16c   : >> { %v778_v34 = vadd.f32 %v777_v11, %v2352_v4  ;;  %1595 = vtanh.f32 %v776_v53  ;;  %v2461_v58 = vpop.eup %1571 }
 0x16d   : >> { %v914_v51 = vpop.f32.mrf.mxu1  ;;  %v781_v55 = vpop.f32.mrf.mxu0 }
 0x16e   : >> { %v782_v18 = vadd.f32 %v781_v55, %v2350_v3  ;;  %1597 = vtanh.f32 %v778_v34  ;;  %v2466_v59 = vpop.eup %1573  ;;  %v915_v34 = vadd.f32 %v914_v51, %v2354_v2  ;;  %v903_v51 = vadd.f32 %v2421_v21, %v2356_v5 }
 0x16f   : >> { %v918_v52 = vpop.f32.mrf.mxu1  ;;  %v783_v7 = vpop.f32.mrf.mxu0  ;;  %v891_v21 = vadd.f32 %v2405_v43, %v2364_v0  ;;  %v879_v43 = vadd.f32 %v2390_v30, %v2374_v17 }
 0x170   : >> { %v784_v11 = vadd.f32 %v783_v7, %v2350_v3  ;;  %1599 = vtanh.f32 %v782_v18  ;;  %v2469_v55 = vpop.eup %1575  ;;  %v919_v53 = vadd.f32 %v918_v52, %v2352_v4  ;;  %v913_v7 = vadd.f32 %v912_v38, %v2354_v2 }
 0x171   : >> { %v920_v54 = vpop.f32.mrf.mxu1  ;;  %v2472_v60 = vpop.eup %1577  ;;  %v901_v38 = vadd.f32 %v2417_v15, %v2356_v5  ;;  %v889_v5 = vadd.f32 %v2401_v39, %v2364_v0  ;;  %v877_v0 = vadd.f32 %v2386_v27, %v2374_v17  ;;  %v867_v17 = vadd.f32 %v2376_v19, %v2384_v25 }
 0x172   : >> { %v921_v48 = vadd.f32 %v920_v54, %v2352_v4  ;;  %1601 = vtanh.f32 %v784_v11  ;;  %v909_v54 = vadd.f32 %v2429_v31, %v2358_v6  ;;  %v907_v4 = vadd.f32 %v2425_v26, %v2358_v6 }
 0x173   : >> { %v924_v56 = vpop.f32.mrf.mxu1  ;;  %v897_v31 = vadd.f32 %v2413_v49, %v2368_v12  ;;  %v895_v6 = vadd.f32 %v2409_v47, %v2368_v12  ;;  %v885_v49 = vadd.f32 %v2396_v35, %v2378_v20  ;;  %v883_v12 = vadd.f32 %v2392_v32, %v2378_v20 }
 0x174   : >> { %v925_v9 = vadd.f32 %v924_v56, %v2350_v3  ;;  %v2475_v56 = vpop.eup %1579  ;;  %v873_v35 = vadd.f32 %v2382_v24, %v2388_v28  ;;  %v871_v32 = vadd.f32 %v2380_v22, %v2388_v28  ;;  %v865_v24 = vadd.f32 %v2372_v16, %v2384_v25 }
 0x175   : >> { %v926_v57 = vpop.f32.mrf.mxu1  ;;  %v861_v22 = vadd.f32 %v2370_v14, %v2398_v36  ;;  %v859_v19 = vadd.f32 %v2366_v1, %v2398_v36  ;;  %v855_v16 = vadd.f32 %v2362_v10, %v2394_v33  ;;  %v853_v14 = vadd.f32 %v2360_v8, %v2394_v33 }
 0x176   : >> { %v927_v23 = vadd.f32 %v926_v57, %v2350_v3  ;;  %v2478_v3 = vpop.eup %1581 }
 0x177   : >> { %v2482_v57 = vpop.eup %1583 }
 0x178   : >> { %1603 = vtanh.f32 %v927_v23  ;;  %v2486_v52 = vpop.eup %1585 }
 0x179   : >> { %1605 = vtanh.f32 %v925_v9  ;;  %v1588_v2 = vpop.eup %1587 }
 0x17a   : >> { %1607 = vtanh.f32 %v921_v48  ;;  %v1590_v18 = vpop.eup %1589 }
 0x17b   : >> { %1609 = vtanh.f32 %v919_v53  ;;  %v1592_v9 = vpop.eup %1591 }
 0x17c   : >> { %1611 = vtanh.f32 %v915_v34  ;;  %v1594_v26 = vpop.eup %1593 }
 0x17d   : >> { %1613 = vtanh.f32 %v913_v7  ;;  %v1596_v11 = vpop.eup %1595 }
 0x17e   : >> { %1615 = vtanh.f32 %v909_v54  ;;  %v1598_v15 = vpop.eup %1597 }
 0x17f   : >> { %1617 = vtanh.f32 %v907_v4  ;;  %v1600_v23 = vpop.eup %1599 }
 0x180   : >> { %1619 = vtanh.f32 %v903_v51  ;;  %v1602_v47 = vpop.eup %1601 }
 0x181   : >> { %1621 = vtanh.f32 %v901_v38  ;;  %991 = vmatprep.subr.mxu0 %v1602_v47 }
 0x182   : >> { %1623 = vtanh.f32 %v897_v31  ;;  %992 = vmatpush1.msra.mxu0 %v1600_v23 }
 0x183   : >> { %1625 = vtanh.f32 %v895_v6  ;;  %993 = vmatprep.subr.mxu0 %v1598_v15 }
 0x184   : >> { %1627 = vtanh.f32 %v891_v21  ;;  %994 = vmatpush1.msra.mxu0 %v1596_v11 }
 0x185   : >> { %v1604_v48 = vpop.eup %1603  ;;  %1629 = vtanh.f32 %v889_v5  ;;  %995 = vmatprep.subr.mxu0 %v1594_v26  ;;  %v1172_v5 = vstv (%p327_p11), %s1171_s27 }
 0x186   : >> { %v1606_v39 = vpop.eup %1605  ;;  %1631 = vtanh.f32 %v885_v49  ;;  %1062 = vmatprep.subr.mxu1 %v1604_v48  ;;  %996 = vmatpush1.msra.mxu0 %v1592_v9 }
 0x187   : >> { %v1608_v20 = vpop.eup %1607  ;;  %1633 = vtanh.f32 %v883_v12  ;;  %1063 = vmatpush1.msra.mxu1 %v1606_v39  ;;  %997 = vmatprep.subr.mxu0 %v1590_v18 }
 0x188   : >> { %v1610_v30 = vpop.eup %1609  ;;  %1635 = vtanh.f32 %v879_v43  ;;  %1064 = vmatprep.subr.mxu1 %v1608_v20  ;;  %998 = vmatpush1.msra.mxu0 %v1588_v2 }
 0x189   : >> { %v1612_v27 = vpop.eup %1611  ;;  %1637 = vtanh.f32 %v877_v0  ;;  %1065 = vmatpush1.msra.mxu1 %v1610_v30  ;;  %999 = vmatprep.subr.mxu0 %v2486_v52 }
 0x18a   : >> { %v1614_v53 = vpop.eup %1613  ;;  %1639 = vtanh.f32 %v873_v35  ;;  %1066 = vmatprep.subr.mxu1 %v1612_v27  ;;  %1000 = vmatpush1.msra.mxu0 %v2482_v57  ;;  %v1136_v57 = vlaneseq }
 0x18b   : >> { %v1616_v28 = vpop.eup %1615  ;;  %1641 = vtanh.f32 %v871_v32  ;;  %1067 = vmatpush1.msra.mxu1 %v1614_v53  ;;  %1001 = vmatprep.subr.mxu0 %v2478_v3 }
 0x18c   : >> { %v1618_v34 = vpop.eup %1617  ;;  %1643 = vtanh.f32 %v867_v17  ;;  %1068 = vmatprep.subr.mxu1 %v1616_v28  ;;  %1002 = vmatpush1.msra.mxu0 %v2475_v56  ;;  %v1137_v4 = vshrl.u32 %v1136_v57, 7  ;;  %vm1158_vm2 = vcmp.lt.s32.totalorder %v1136_v57, 512 }
 0x18d   : >> { %v1620_v25 = vpop.eup %1619  ;;  %1645 = vtanh.f32 %v865_v24  ;;  %1069 = vmatpush1.msra.mxu1 %v1618_v34  ;;  %1003 = vmatprep.subr.mxu0 %v2472_v60 }
 0x18e   : >> { %v1622_v7 = vpop.eup %1621  ;;  %1647 = vtanh.f32 %v861_v22  ;;  %1070 = vmatprep.subr.mxu1 %v1620_v25  ;;  %1004 = vmatpush1.msra.mxu0 %v2469_v55 }
 0x18f   : >> { %v1624_v36 = vpop.eup %1623  ;;  %1649 = vtanh.f32 %v859_v19  ;;  %1071 = vmatpush1.msra.mxu1 %v1622_v7  ;;  %1005 = vmatprep.subr.mxu0 %v2466_v59 }
 0x190   : >> { %v1626_v10 = vpop.eup %1625  ;;  %1651 = vtanh.f32 %v855_v16  ;;  %1072 = vmatprep.subr.mxu1 %v1624_v36  ;;  %1006 = vmatpush1.msra.mxu0 %v2461_v58 }
 0x191   : >> { %v1628_v8 = vpop.eup %1627  ;;  %1653 = vtanh.f32 %v853_v14  ;;  %1073 = vmatpush1.msra.mxu1 %v1626_v10  ;;  %1007 = vmatprep.subr.mxu0 %v2459_v46 }
 0x192   : >> { %v1630_v33 = vpop.eup %1629  ;;  %1074 = vmatprep.subr.mxu1 %v1628_v8  ;;  %1008 = vmatpush1.msra.mxu0 %v2456_v40 }
 0x193   : >> { %v1632_v1 = vpop.eup %1631  ;;  %1075 = vmatpush1.msra.mxu1 %v1630_v33  ;;  %1009 = vmatprep.subr.mxu0 %v2454_v13 }
 0x194   : >> { %v1634_v54 = vpop.eup %1633  ;;  %1076 = vmatprep.subr.mxu1 %v1632_v1  ;;  %1010 = vmatpush1.msra.mxu0 %v2451_v29 }
 0x195   : >> { %v1636_v3 = vpop.eup %1635  ;;  %1077 = vmatpush1.msra.mxu1 %v1634_v54  ;;  %1011 = vmatprep.subr.mxu0 %v2448_v45 }
 0x196   : >> { %v1638_v56 = vpop.eup %1637  ;;  %1078 = vmatprep.subr.mxu1 %v1636_v3  ;;  %1012 = vmatpush1.msra.mxu0 %v2445_v41  ;;  %v2785_v41 = vld [vmem:[#allocation19_spill] sm:$0xff] }
 0x197   : >> { %v1640_v60 = vpop.eup %1639  ;;  %1079 = vmatpush1.msra.mxu1 %v1638_v56  ;;  %1013 = vmatprep.subr.mxu0 %v2442_v37  ;;  %v1735_v37 = vmov 1966171168  }
 0x198   : >> { %v1642_v55 = vpop.eup %1641  ;;  %1080 = vmatprep.subr.mxu1 %v1640_v60  ;;  %1014 = vmatpush1.msra.mxu0 %v2439_v44  ;;  %v1134_v45 = vunpack.c.l.s4 %v1735_v37 }
 0x199   : >> { %v1644_v59 = vpop.eup %1643  ;;  %1081 = vmatpush1.msra.mxu1 %v1642_v55  ;;  %1015 = vmatprep.subr.mxu0 %v2436_v42 }
 0x19a   : >> { %v1646_v58 = vpop.eup %1645  ;;  %1082 = vmatprep.subr.mxu1 %v1644_v59  ;;  %1016 = vmatpush1.msra.mxu0 %v2433_v50  ;;  %v1135_v44 = vunpack.c.0.s8 %v1134_v45 }
 0x19b   : >> { %v1648_v46 = vpop.eup %1647  ;;  %1083 = vmatpush1.msra.mxu1 %v1646_v58  ;;  %1370 = vmatmul.mubr.msk.f32.vlgmr.msra.gmra.mxu0 %vm981_vm1, %v2785_v41 }
 0x19c   : >> { %v1650_v40 = vpop.eup %1649  ;;  %1084 = vmatprep.subr.mxu1 %v1648_v46  ;;  %v1138_v42 = vsub.s32 %v1135_v44, %v1137_v4 }
 0x19d   : >> { %v1652_v13 = vpop.eup %1651  ;;  %1085 = vmatpush1.msra.mxu1 %v1650_v40 }
 0x19e   : >> { %v1654_v29 = vpop.eup %1653  ;;  %1086 = vmatprep.subr.mxu1 %v1652_v13 }
 0x19f   : >> { %1087 = vmatpush1.msra.mxu1 %v1654_v29 }
 0x1a0   : >> { %1371 = vmatmul.mubr.msk.f32.vlgmr.msra.gmra.mxu1 %vm981_vm1, %v2785_v41 }
 0x25b   : >> { %v1051_v52 = vpop.f32.mrf.mxu0 }
 0x25d   : >> { %v1053_v2 = vpop.f32.mrf.mxu0 }
 0x25e   : >> { %v1131_v38 = vcombine.low %v1051_v52, %v1053_v2 }
 0x260   : >> { %v1122_v51 = vpop.f32.mrf.mxu1  ;;  %v1139_v31 = vrot.slane %v1131_v38, %v1138_v42 }
 0x262   : >> { %v1124_v18 = vpop.f32.mrf.mxu1 }
 0x263   : >> { %v1132_v50 = vcombine.low %v1122_v51, %v1124_v18 }
 0x265   : >> { %v1146_v9 = vrot.slane %v1132_v50, %v1138_v42 }
 0x267   : >> { %v1147_v6 = vcombine.low %v1139_v31, %v1146_v9  ;;  %329 = sbr.rel (!%p327_p11) target bundleno = 60 (0x3c), region = 84 }
 0x269   : >> { %v1154_v26 = vrot.slane %v1147_v6, %v1138_v42 }
 0x26b   : >> { %1168 = vst.msk [vmem:[%s1167_s26] ss:$4 sm:$0xf] %vm1158_vm2, %v1154_v26 }
 0x272   : > { %v1169_v21 = vld [vmem:[%s2092_s7] sm:$0xff]  ;;  %v1170_v11 = vld [vmem:[%s2092_s7 + $0x8] sm:$0xff] }
 0x273   : > { %v1173_v15 = vadd.f32 %v1172_v5, %v1169_v21  ;;  %v1174_v49 = vadd.f32 %v1172_v5, %v1170_v11 }
 0x275   : > { %v1374_v23 = vmul.f32 -1.442695, %v1173_v15  ;;  %v1375_v12 = vmul.f32 -1.442695, %v1174_v49 }
 0x277   : > { %1655 = vpow2.f32 %v1374_v23 }
 0x278   : > { %1657 = vpow2.f32 %v1375_v12 }
 0x284   : > { %v1656_v47 = vpop.eup %1655 }
 0x285   : > { %v1658_v43 = vpop.eup %1657  ;;  %v1181_v61 = vadd.f32 1.0, %v1656_v47 }
 0x286   : > { %v1182_v62 = vadd.f32 1.0, %v1658_v43 }
 0x287   : > { %1659 = vrcp.f32 %v1181_v61 }
 0x288   : > { %1661 = vrcp.f32 %v1182_v62 }
 0x294   : > { %v1660_v63 = vpop.eup %1659 }
 0x295   : > { %v1662_v48 = vpop.eup %1661  ;;  %1187 = vst [vmem:[%s2092_s7] sm:$0xff] %v1660_v63 }
 0x296   : > { %1188 = vst [vmem:[%s2092_s7 + $0x8] sm:$0xff] %v1662_v48 }
 0x297   : > { %1676 = shalt.err (!%p1673_p4)
}
 0x298   : > { %s1677_s7 = scalar_lea.hbm %s2557_s12, 256  ;;  %s1681_s18 = scalar_lea.hbm %s2607_s5, 512 }
 0x299   : > { %p1678_p7 = scmp.ne.s32.totalorder %s2557_s12, %s1677_s7  ;;  %p1682_p10 = scmp.lt.s32.totalorder %s2557_s12, %s2607_s5 }
 0x29a   : > { %p1683_p11 = scmp.lt.s32.totalorder %s1681_s18, %s1677_s7 }
 0x29b   : > { %p1679_p8 = pnand %p1678_p7, %p1808_p5 }
 0x29c   : > { %p1684_p12 = por %p1683_p11, %p1682_p10 }
 0x29d   : > { %p1680_p9 = pneg %p1679_p8 }
 0x29f   : > { %p1685_p13 = pnand %p1684_p12, %p1680_p9 }
 0x2a1   : > { %1688 = shalt.err (!%p1685_p13)
}
 0x2a2   : > { %1499 = dma.vmem_to_hbm [thread:$0]  (%p1808_p5), %s2559_s9, 256, %s2557_s12, %s1190_s14  }
 0x2a3 PF: > { %p1505_p0 = scmp.ge.s32.totalorder %s1727_s23, 2  ;;  %s1216_s26 = sand.u32 1, %s1715_s20  }
 0x2a4   : > { %s1217_s27 = scalar_lea.sflag [#allocation4], %s1216_s26 }
 0x2a5   : > { %p1502_p1 = pnand %p1505_p0, %p1812_p6 }
 0x2a7   : > { %p1503_p2 = pneg %p1502_p1 }
 0x2a9   : > { %1710 = dma.done.wait (%p1503_p2), %s1217_s27, 256  }
 0x2aa   : > { %1712 = vsyncadd (%p1503_p2), %s1217_s27, 4294967040  ;;  %p16_p3 = scmp.ge.s32.totalorder %s1795_s25, 4   ;;  %s2786_s20 = smov %s1719_s21 }
 0x2ab   : > { %s2787_s21 = smov %s1723_s22  ;;  %s2788_s22 = smov %s1806_s28 }
 0x2ac   : > { %s2789_s23 = smov %s1795_s25  ;;  %18 = sbr.rel (!%p16_p3) target bundleno = 5 (0x5), region = 95 }
 0x2b1   :  { %1222 = vsyncpa [#allocation4], 1 }
 0x2b2   :  { %1224 = vsyncpa [#allocation4 + $0x1], 1 }

</bundles_post_ra>
